<compile_context>
chip_gen: v6e
topology: v6e:2x2x1
jax: 0.10.0
libtpu: 0.0.40
codegen_flags: <defaults>
</compile_context>

<pallas_src>
import jax
import jax.numpy as jnp
from jax.experimental import pallas as pl
from jax.experimental.pallas import tpu as pltpu

B, S, H = 2, 8, 32
NUM_GNN_LAYERS = 3
LN_EPS = 1e-5

# --- packed-parameter slab layout (single f32 array, last dim = H, row-major) ----------
W_GCN0 = 0                                  # rows [0, L*H)      : GCN weights, layer l at [l*H, (l+1)*H)
W_GATE0 = NUM_GNN_LAYERS * H                # rows [96, 160)     : gate weight (2H, H), 8-aligned start
B_GCN0 = W_GATE0 + 2 * H                    # rows [160, 163)    : GCN biases, one row per layer
B_GATE_ROW = B_GCN0 + NUM_GNN_LAYERS        # row 163            : gate bias
GAMMA_ROW = B_GATE_ROW + 1                  # row 164            : LayerNorm gamma
BETA_ROW = GAMMA_ROW + 1                    # row 165            : LayerNorm beta
P_ROWS = ((BETA_ROW + 1 + 7) // 8) * 8      # 168 (padded to a sublane multiple)


def integration_kernel(x_ref, p_ref, out_ref):
    x = x_ref[...]                                       # (B*S, H) whole problem in VMEM

    # Per-example mean over the S nodes.  S == 8 == sublane count, so each group mean is
    # a cheap sublane reduce; the tiny static B loop is unrolled at trace time.
    x_mean = jnp.concatenate(
        [jnp.mean(x[b * S:(b + 1) * S, :], axis=0, keepdims=True) for b in range(B)],
        axis=0)                                          # (B, H)

    # GNN encoder stand-in (residual GCN over the fully connected per-example graph).
    # Fusion: every layer adds the SAME (1,H) row to all nodes of a graph, so we keep a
    # (B,H) running row accumulator, do (B,H)@(H,H) matmuls only, and broadcast once at
    # the end (exact; matches the unfused pure-JAX reference).
    acc = jnp.zeros((B, H), dtype=jnp.float32)
    for l in range(NUM_GNN_LAYERS):
        w_l = p_ref[W_GCN0 + l * H:W_GCN0 + (l + 1) * H, :]      # (H, H) static view
        b_l = p_ref[B_GCN0 + l:B_GCN0 + l + 1, :]                # (1, H) static view
        agg = x_mean + acc                                       # mean of h_{l-1} over nodes
        upd = jnp.maximum(
            jnp.dot(agg, w_l, preferred_element_type=jnp.float32) + b_l, 0.0)
        acc = acc + upd                                          # graph_residual=True

    graph_emb = x_mean + acc                             # (B, H) mean readout of gnn_output

    # Broadcast per-example rows back over their S sequence positions (identity scatter).
    acc_exp = jnp.concatenate(
        [jnp.broadcast_to(acc[b:b + 1, :], (S, H)) for b in range(B)], axis=0)
    graph_exp = jnp.concatenate(
        [jnp.broadcast_to(graph_emb[b:b + 1, :], (S, H)) for b in range(B)], axis=0)
    enhanced = x + acc_exp                               # (B*S, H)

    # Fused integration gate: sigmoid(concat([enhanced, graph_exp], -1) @ W_gate + b).
    # One (B*S, 2H) @ (2H, H) MXU pass instead of two dependent K=32 passes.
    w_gate = p_ref[W_GATE0:W_GATE0 + 2 * H, :]           # (2H, H) static view
    b_gate = p_ref[B_GATE_ROW:B_GATE_ROW + 1, :]         # (1, H)
    cat = jnp.concatenate([enhanced, graph_exp], axis=-1)          # (B*S, 2H) lane concat
    gate = jax.nn.sigmoid(
        jnp.dot(cat, w_gate, preferred_element_type=jnp.float32) + b_gate)
    integrated = enhanced * gate + graph_exp * (1.0 - gate)

    # residual + LayerNorm over the hidden dim
    y = integrated + x
    mu = jnp.mean(y, axis=-1, keepdims=True)
    var = jnp.mean((y - mu) ** 2, axis=-1, keepdims=True)
    y_hat = (y - mu) * jax.lax.rsqrt(var + LN_EPS)
    out_ref[...] = (y_hat * p_ref[GAMMA_ROW:GAMMA_ROW + 1, :]
                    + p_ref[BETA_ROW:BETA_ROW + 1, :])


def pack_params(w_gcn, b_gcn, w_gate_full, b_gate, gamma, beta):
    """Pack all parameters into one (P_ROWS, H) f32 slab (single DMA into the kernel)."""
    slab = jnp.concatenate(
        [w_gcn.reshape(NUM_GNN_LAYERS * H, H),      # rows [0, 96)
         w_gate_full.reshape(2 * H, H),             # rows [96, 160)
         b_gcn.reshape(NUM_GNN_LAYERS, H),          # rows [160, 163)
         b_gate.reshape(1, H),                      # row 163
         gamma.reshape(1, H),                       # row 164
         beta.reshape(1, H)],                       # row 165
        axis=0)
    pad = P_ROWS - slab.shape[0]
    if pad:
        slab = jnp.concatenate([slab, jnp.zeros((pad, H), slab.dtype)], axis=0)
    return slab


def transformer_gnn_integration(hidden_states, w_gcn, b_gcn, w_gate_full, b_gate,
                                gamma, beta):
    # Wrapper-side reshape to a 2-D (B*S, H) slab: free row-major view, no in-kernel copy.
    x2 = hidden_states.reshape(B * S, H)
    slab = pack_params(w_gcn, b_gcn, w_gate_full, b_gate, gamma, beta)

    flops = (2 * B * H * H * NUM_GNN_LAYERS          # fused GCN row matmuls
             + 2 * (B * S) * (2 * H) * H             # fused gate matmul
             + 12 * B * S * H)                       # elementwise gate/LN epilogue
    bytes_accessed = 4 * int(x2.size + slab.size + B * S * H)

    out2 = pl.pallas_call(
        integration_kernel,
        out_shape=jax.ShapeDtypeStruct((B * S, H), jnp.float32),
        grid_spec=pltpu.PrefetchScalarGridSpec(
            num_scalar_prefetch=0,
            grid=(1,),                               # single invocation: whole problem in VMEM
            in_specs=[
                pl.BlockSpec((B * S, H), lambda i: (0, 0)),     # hidden states slab
                pl.BlockSpec((P_ROWS, H), lambda i: (0, 0)),    # packed parameter slab
            ],
            out_specs=pl.BlockSpec((B * S, H), lambda i: (0, 0)),
        ),
        compiler_params=pltpu.CompilerParams(dimension_semantics=("arbitrary",)),
        cost_estimate=pl.CostEstimate(
            flops=flops,
            transcendentals=B * S * H + B * S,       # sigmoid exps + LN rsqrts
            bytes_accessed=bytes_accessed),
    )(x2, slab)

    return out2.reshape(B, S, H)


def reference_jax(hidden_states, w_gcn, b_gcn, w_gate_full, b_gate, gamma, beta):
    """Pure-JAX reference of the same forward pass (un-fused form), for correctness."""
    outs = []
    for b in range(B):
        x = hidden_states[b]
        h = x
        for l in range(NUM_GNN_LAYERS):
            agg = jnp.broadcast_to(jnp.mean(h, axis=0, keepdims=True), (S, H))
            h = h + jnp.maximum(agg @ w_gcn[l] + b_gcn[l], 0.0)
        graph_emb = jnp.mean(h, axis=0, keepdims=True)
        graph_exp = jnp.broadcast_to(graph_emb, (S, H))
        gate = jax.nn.sigmoid(
            jnp.concatenate([h, graph_exp], axis=-1) @ w_gate_full + b_gate)
        integrated = h * gate + graph_exp * (1.0 - gate)
        y = integrated + x
        mu = jnp.mean(y, axis=-1, keepdims=True)
        var = jnp.mean((y - mu) ** 2, axis=-1, keepdims=True)
        outs.append((y - mu) * jax.lax.rsqrt(var + LN_EPS) * gamma + beta)
    return jnp.stack(outs, axis=0)


if __name__ == "__main__":
    key = jax.random.PRNGKey(0)
    keys = jax.random.split(key, 8)

    hidden_states = jax.random.normal(keys[0], (B, S, H), dtype=jnp.float32)

    # Deterministic synthetic parameters (shapes implied by the module's __init__).
    # nn.Linear(2H, H) gate weight is used pre-transposed to (in, out) layout.
    # TODO(synk): apply the (out,in)->(in,out) transpose when loading real checkpoints.
    w_gcn = 0.05 * jax.random.normal(keys[1], (NUM_GNN_LAYERS, H, H), dtype=jnp.float32)
    b_gcn = 0.05 * jax.random.normal(keys[2], (NUM_GNN_LAYERS, H), dtype=jnp.float32)
    w_gate_full = 0.05 * jax.random.normal(keys[3], (2 * H, H), dtype=jnp.float32)
    b_gate = 0.05 * jax.random.normal(keys[4], (H,), dtype=jnp.float32)
    gamma = jnp.ones((H,), dtype=jnp.float32)
    beta = jnp.zeros((H,), dtype=jnp.float32)

    out = transformer_gnn_integration(hidden_states, w_gcn, b_gcn, w_gate_full,
                                      b_gate, gamma, beta)
    out = jax.block_until_ready(out)

    ref = jax.block_until_ready(
        reference_jax(hidden_states, w_gcn, b_gcn, w_gate_full, b_gate, gamma, beta))
    assert out.shape == (B, S, H)
    assert jnp.allclose(out, ref, atol=1e-4, rtol=1e-4), "mismatch vs pure-JAX reference"

    print("KERNEL_OK")
</pallas_src>

<mosaic_0001>
module attributes {stable_mosaic.version = 11 : i64} {
  func.func @integration_kernel(%arg0: i32, %arg1: memref<16x32xf32, #tpu.memory_space<vmem>>, %arg2: memref<168x32xf32, #tpu.memory_space<vmem>>, %arg3: memref<16x32xf32, #tpu.memory_space<vmem>>) attributes {dimension_semantics = [#tpu.dimension_semantics<arbitrary>], iteration_bounds = array<i64: 1>, scalar_prefetch = 0 : i64, scratch_operands = 0 : i64, tpu.core_type = #tpu.core_type<tc>, window_params = [{pipeline_mode = #tpu.pipeline_mode<synchronous>, transform_indices = @transform_0, window_bounds = array<i64: 16, 32>}, {pipeline_mode = #tpu.pipeline_mode<synchronous>, transform_indices = @transform_1, window_bounds = array<i64: 168, 32>}, {pipeline_mode = #tpu.pipeline_mode<synchronous>, transform_indices = @transform_2, window_bounds = array<i64: 16, 32>}]} {
    %c0 = arith.constant 0 : index
    %c0_0 = arith.constant 0 : index
    %0 = vector.load %arg1[%c0, %c0_0] : memref<16x32xf32, #tpu.memory_space<vmem>>, vector<16x32xf32>
    %1 = vector.extract_strided_slice %0 {offsets = [0, 0], sizes = [8, 32], strides = [1, 1]} : vector<16x32xf32> to vector<8x32xf32>
    %cst = arith.constant dense<0.000000e+00> : vector<32xf32>
    %2 = vector.multi_reduction <add>, %1, %cst [0] : vector<8x32xf32> to vector<32xf32>
    %3 = vector.shape_cast %2 : vector<32xf32> to vector<1x32xf32>
    %cst_1 = arith.constant 8.000000e+00 : f32
    %4 = vector.broadcast %cst_1 : f32 to vector<1x32xf32>
    %5 = arith.divf %3, %4 : vector<1x32xf32>
    %6 = vector.extract_strided_slice %0 {offsets = [8, 0], sizes = [8, 32], strides = [1, 1]} : vector<16x32xf32> to vector<8x32xf32>
    %cst_2 = arith.constant dense<0.000000e+00> : vector<32xf32>
    %7 = vector.multi_reduction <add>, %6, %cst_2 [0] : vector<8x32xf32> to vector<32xf32>
    %8 = vector.shape_cast %7 : vector<32xf32> to vector<1x32xf32>
    %cst_3 = arith.constant 8.000000e+00 : f32
    %9 = vector.broadcast %cst_3 : f32 to vector<1x32xf32>
    %10 = arith.divf %8, %9 : vector<1x32xf32>
    %11 = tpu.concatenate %5, %10 in 0 : vector<1x32xf32>, vector<1x32xf32> -> vector<2x32xf32>
    %cst_4 = arith.constant 0.000000e+00 : f32
    %12 = vector.broadcast %cst_4 : f32 to vector<2x32xf32>
    %c0_5 = arith.constant 0 : index
    %c0_6 = arith.constant 0 : index
    %13 = vector.load %arg2[%c0_5, %c0_6] : memref<168x32xf32, #tpu.memory_space<vmem>>, vector<32x32xf32>
    %c160 = arith.constant 160 : index
    %c0_7 = arith.constant 0 : index
    %14 = vector.load %arg2[%c160, %c0_7] : memref<168x32xf32, #tpu.memory_space<vmem>>, vector<1x32xf32>
    %15 = arith.addf %11, %12 : vector<2x32xf32>
    %cst_8 = arith.constant dense<0.000000e+00> : vector<2x32xf32>
    %16 = tpu.matmul %15, %13, %cst_8 {dimension_numbers = #tpu.dot_dimension_numbers<[1], [0], [0], [1], [0, 0, 1, 1], [], []>} : vector<2x32xf32>, vector<32x32xf32>, vector<2x32xf32> -> vector<2x32xf32>
    %17 = vector.broadcast %14 : vector<1x32xf32> to vector<2x32xf32>
    %18 = arith.addf %16, %17 : vector<2x32xf32>
    %cst_9 = arith.constant 0.000000e+00 : f32
    %19 = vector.broadcast %cst_9 : f32 to vector<2x32xf32>
    %20 = arith.maximumf %18, %19 : vector<2x32xf32>
    %21 = arith.addf %12, %20 : vector<2x32xf32>
    %c32 = arith.constant 32 : index
    %c0_10 = arith.constant 0 : index
    %22 = vector.load %arg2[%c32, %c0_10] : memref<168x32xf32, #tpu.memory_space<vmem>>, vector<32x32xf32>
    %c161 = arith.constant 161 : index
    %c0_11 = arith.constant 0 : index
    %23 = vector.load %arg2[%c161, %c0_11] : memref<168x32xf32, #tpu.memory_space<vmem>>, vector<1x32xf32>
    %24 = arith.addf %11, %21 : vector<2x32xf32>
    %cst_12 = arith.constant dense<0.000000e+00> : vector<2x32xf32>
    %25 = tpu.matmul %24, %22, %cst_12 {dimension_numbers = #tpu.dot_dimension_numbers<[1], [0], [0], [1], [0, 0, 1, 1], [], []>} : vector<2x32xf32>, vector<32x32xf32>, vector<2x32xf32> -> vector<2x32xf32>
    %26 = vector.broadcast %23 : vector<1x32xf32> to vector<2x32xf32>
    %27 = arith.addf %25, %26 : vector<2x32xf32>
    %cst_13 = arith.constant 0.000000e+00 : f32
    %28 = vector.broadcast %cst_13 : f32 to vector<2x32xf32>
    %29 = arith.maximumf %27, %28 : vector<2x32xf32>
    %30 = arith.addf %21, %29 : vector<2x32xf32>
    %c64 = arith.constant 64 : index
    %c0_14 = arith.constant 0 : index
    %31 = vector.load %arg2[%c64, %c0_14] : memref<168x32xf32, #tpu.memory_space<vmem>>, vector<32x32xf32>
    %c162 = arith.constant 162 : index
    %c0_15 = arith.constant 0 : index
    %32 = vector.load %arg2[%c162, %c0_15] : memref<168x32xf32, #tpu.memory_space<vmem>>, vector<1x32xf32>
    %33 = arith.addf %11, %30 : vector<2x32xf32>
    %cst_16 = arith.constant dense<0.000000e+00> : vector<2x32xf32>
    %34 = tpu.matmul %33, %31, %cst_16 {dimension_numbers = #tpu.dot_dimension_numbers<[1], [0], [0], [1], [0, 0, 1, 1], [], []>} : vector<2x32xf32>, vector<32x32xf32>, vector<2x32xf32> -> vector<2x32xf32>
    %35 = vector.broadcast %32 : vector<1x32xf32> to vector<2x32xf32>
    %36 = arith.addf %34, %35 : vector<2x32xf32>
    %cst_17 = arith.constant 0.000000e+00 : f32
    %37 = vector.broadcast %cst_17 : f32 to vector<2x32xf32>
    %38 = arith.maximumf %36, %37 : vector<2x32xf32>
    %39 = arith.addf %30, %38 : vector<2x32xf32>
    %40 = arith.addf %11, %39 : vector<2x32xf32>
    %41 = vector.extract_strided_slice %39 {offsets = [0, 0], sizes = [1, 32], strides = [1, 1]} : vector<2x32xf32> to vector<1x32xf32>
    %42 = vector.shape_cast %41 : vector<1x32xf32> to vector<1x32xf32>
    %43 = vector.broadcast %42 : vector<1x32xf32> to vector<8x32xf32>
    %44 = vector.extract_strided_slice %39 {offsets = [1, 0], sizes = [1, 32], strides = [1, 1]} : vector<2x32xf32> to vector<1x32xf32>
    %45 = vector.shape_cast %44 : vector<1x32xf32> to vector<1x32xf32>
    %46 = vector.broadcast %45 : vector<1x32xf32> to vector<8x32xf32>
    %47 = tpu.concatenate %43, %46 in 0 : vector<8x32xf32>, vector<8x32xf32> -> vector<16x32xf32>
    %48 = vector.extract_strided_slice %40 {offsets = [0, 0], sizes = [1, 32], strides = [1, 1]} : vector<2x32xf32> to vector<1x32xf32>
    %49 = vector.shape_cast %48 : vector<1x32xf32> to vector<1x32xf32>
    %50 = vector.broadcast %49 : vector<1x32xf32> to vector<8x32xf32>
    %51 = vector.extract_strided_slice %40 {offsets = [1, 0], sizes = [1, 32], strides = [1, 1]} : vector<2x32xf32> to vector<1x32xf32>
    %52 = vector.shape_cast %51 : vector<1x32xf32> to vector<1x32xf32>
    %53 = vector.broadcast %52 : vector<1x32xf32> to vector<8x32xf32>
    %54 = tpu.concatenate %50, %53 in 0 : vector<8x32xf32>, vector<8x32xf32> -> vector<16x32xf32>
    %55 = arith.addf %0, %47 : vector<16x32xf32>
    %c96 = arith.constant 96 : index
    %c0_18 = arith.constant 0 : index
    %56 = vector.load %arg2[%c96, %c0_18] : memref<168x32xf32, #tpu.memory_space<vmem>>, vector<64x32xf32>
    %c163 = arith.constant 163 : index
    %c0_19 = arith.constant 0 : index
    %57 = vector.load %arg2[%c163, %c0_19] : memref<168x32xf32, #tpu.memory_space<vmem>>, vector<1x32xf32>
    %58 = tpu.concatenate %55, %54 in 1 : vector<16x32xf32>, vector<16x32xf32> -> vector<16x64xf32>
    %cst_20 = arith.constant dense<0.000000e+00> : vector<16x32xf32>
    %59 = tpu.matmul %58, %56, %cst_20 {dimension_numbers = #tpu.dot_dimension_numbers<[1], [0], [0], [1], [0, 0, 1, 1], [], []>} : vector<16x64xf32>, vector<64x32xf32>, vector<16x32xf32> -> vector<16x32xf32>
    %60 = vector.broadcast %57 : vector<1x32xf32> to vector<16x32xf32>
    %61 = arith.addf %59, %60 : vector<16x32xf32>
    %62 = arith.negf %61 : vector<16x32xf32>
    %63 = math.exp %62 : vector<16x32xf32>
    %cst_21 = arith.constant 1.000000e+00 : f32
    %64 = vector.broadcast %cst_21 : f32 to vector<16x32xf32>
    %65 = arith.addf %64, %63 : vector<16x32xf32>
    %66 = arith.divf %64, %65 : vector<16x32xf32>
    %67 = arith.mulf %55, %66 : vector<16x32xf32>
    %cst_22 = arith.constant 1.000000e+00 : f32
    %68 = vector.broadcast %cst_22 : f32 to vector<16x32xf32>
    %69 = arith.subf %68, %66 : vector<16x32xf32>
    %70 = arith.mulf %54, %69 : vector<16x32xf32>
    %71 = arith.addf %67, %70 : vector<16x32xf32>
    %72 = arith.addf %71, %0 : vector<16x32xf32>
    %cst_23 = arith.constant dense<0.000000e+00> : vector<16xf32>
    %73 = vector.multi_reduction <add>, %72, %cst_23 [1] : vector<16x32xf32> to vector<16xf32>
    %74 = vector.shape_cast %73 : vector<16xf32> to vector<16x1xf32>
    %cst_24 = arith.constant 3.200000e+01 : f32
    %75 = vector.broadcast %cst_24 : f32 to vector<16x1xf32>
    %76 = arith.divf %74, %75 : vector<16x1xf32>
    %77 = vector.broadcast %76 : vector<16x1xf32> to vector<16x32xf32>
    %78 = arith.subf %72, %77 : vector<16x32xf32>
    %79 = arith.mulf %78, %78 : vector<16x32xf32>
    %cst_25 = arith.constant dense<0.000000e+00> : vector<16xf32>
    %80 = vector.multi_reduction <add>, %79, %cst_25 [1] : vector<16x32xf32> to vector<16xf32>
    %81 = vector.shape_cast %80 : vector<16xf32> to vector<16x1xf32>
    %cst_26 = arith.constant 3.200000e+01 : f32
    %82 = vector.broadcast %cst_26 : f32 to vector<16x1xf32>
    %83 = arith.divf %81, %82 : vector<16x1xf32>
    %84 = vector.broadcast %76 : vector<16x1xf32> to vector<16x32xf32>
    %85 = arith.subf %72, %84 : vector<16x32xf32>
    %cst_27 = arith.constant 9.99999974E-6 : f32
    %86 = vector.broadcast %cst_27 : f32 to vector<16x1xf32>
    %87 = arith.addf %83, %86 : vector<16x1xf32>
    %88 = math.rsqrt %87 : vector<16x1xf32>
    %89 = vector.broadcast %88 : vector<16x1xf32> to vector<16x32xf32>
    %90 = arith.mulf %85, %89 : vector<16x32xf32>
    %c164 = arith.constant 164 : index
    %c0_28 = arith.constant 0 : index
    %91 = vector.load %arg2[%c164, %c0_28] : memref<168x32xf32, #tpu.memory_space<vmem>>, vector<1x32xf32>
    %92 = vector.broadcast %91 : vector<1x32xf32> to vector<16x32xf32>
    %93 = arith.mulf %90, %92 : vector<16x32xf32>
    %c165 = arith.constant 165 : index
    %c0_29 = arith.constant 0 : index
    %94 = vector.load %arg2[%c165, %c0_29] : memref<168x32xf32, #tpu.memory_space<vmem>>, vector<1x32xf32>
    %95 = vector.broadcast %94 : vector<1x32xf32> to vector<16x32xf32>
    %96 = arith.addf %93, %95 : vector<16x32xf32>
    %c0_30 = arith.constant 0 : index
    %c0_31 = arith.constant 0 : index
    %97 = vector.load %arg3[%c0_30, %c0_31] : memref<16x32xf32, #tpu.memory_space<vmem>>, vector<16x32xf32>
    tpu.vector_store %arg3[%c0_30, %c0_31], %96 {strides = array<i32>} : memref<16x32xf32, #tpu.memory_space<vmem>>, vector<16x32xf32>,
    return
  }
  func.func @transform_0(%arg0: i32) -> (i32, i32) {
    %c0_i32 = arith.constant 0 : i32
    %c0_i32_0 = arith.constant 0 : i32
    %c0_i32_1 = arith.constant 0 : i32
    return %c0_i32, %c0_i32_0 : i32, i32
  }
  func.func @transform_1(%arg0: i32) -> (i32, i32) {
    %c0_i32 = arith.constant 0 : i32
    %c0_i32_0 = arith.constant 0 : i32
    %c0_i32_1 = arith.constant 0 : i32
    return %c0_i32, %c0_i32_0 : i32, i32
  }
  func.func @transform_2(%arg0: i32) -> (i32, i32) {
    %c0_i32 = arith.constant 0 : i32
    %c0_i32_0 = arith.constant 0 : i32
    %c0_i32_1 = arith.constant 0 : i32
    return %c0_i32, %c0_i32_0 : i32, i32
  }
}

</mosaic_0001>

<bundles_post_ra>
// kernel: tpu_custom_call.1
= control target key start
LH: loop header
LB: loop body
LE: loop exit
PB: predicated region body
PF: predicated region fallthrough
CT: control target
= control target key end

     0   :  { %vm14_vm0 = vcmask 261120   ;;  %v624_v1 = vmov 0.0   ;;  %vm625_vm1 = vmmov 0   ;;  %s779_s0 = inlined_call_operand.vmem [shape: f32[16,32], index: 0, kind: input, shape index: {}]   ;;  %s780_s1 = inlined_call_operand.vmem [shape: f32[168,32], index: 1, kind: input, shape index: {}]   ;;  %s781_s2 = inlined_call_operand.hbm [shape: f32[16,32], index: 2, kind: output, shape index: {}]  }
   0x1   :  { %v37_v0 = vld [vmem:[%s780_s1 + $0x18] sm:$0xff]  ;;  %532 = vmatprep.subr.mxu0 %v624_v1  ;;  %v36_v2 = vld [vmem:[%s780_s1 + $0x10] sm:$0xff]  ;;  %540 = vmatprep.mubr.msk.f32.mxu0 %vm625_vm1, %v624_v1  ;;  %v657_v3 = vld [vmem:[%s779_s0] sm:$0xff] }
   0x2   :  { %v662_v4 = vld [vmem:[%s779_s0 + $0x8] sm:$0xff]  ;;  %533 = vmatpush3.msra.mxu0 %v37_v0  ;;  %v15_v5 = vsel %vm14_vm0, %v657_v3, 0.0  ;;  %543 = vmatprep.subr.mxu1 %v624_v1 }
   0x3   :  { %v24_v6 = vsel %vm14_vm0, %v662_v4, 0.0 }
   0x4   :  { %7 = vsyncpa [#allocation3], 0  ;;  %534 = vmatprep.subr.mxu0 %v624_v1  ;;  %v35_v7 = vld [vmem:[%s780_s1 + $0x8] sm:$0xff]  ;;  %v16_v8 = vrot.slane %v15_v5, 4  ;;  %v25_v9 = vrot.slane %v24_v6, 4  ;;  %551 = vmatprep.mubr.msk.f32.mxu1 %vm625_vm1, %v624_v1  ;;  %v34_v10 = vld [vmem:[%s780_s1] sm:$0xff]  ;;  %v290_v51 = vlaneseq }
   0x5   :  { %535 = vmatpush3.msra.mxu0 %v36_v2  ;;  %vm32_vm2 = vcmask 1040384   ;;  %v122_v24 = vld [vmem:[%s780_s1 + $0x38] sm:$0xff]  ;;  %v121_v25 = vld [vmem:[%s780_s1 + $0x30] sm:$0xff]  ;;  %v120_v26 = vld [vmem:[%s780_s1 + $0x28] sm:$0xff]  ;;  %s626_s29 = smov 32   ;;  %vm331_vm3 = vcmask 523264  }
   0x6   :  { %536 = vmatprep.subr.mxu0 %v624_v1  ;;  %v17_v11 = vadd.f32 %v16_v8, %v15_v5  ;;  %v26_v12 = vadd.f32 %v25_v9, %v24_v6  ;;  %544 = vmatpush3.msra.mxu1 %v122_v24  ;;  %v119_v27 = vld [vmem:[%s780_s1 + $0x20] sm:$0xff]  ;;  %v207_v34 = vld [vmem:[%s780_s1 + $0x58] sm:$0xff]  ;;  %v206_v35 = vld [vmem:[%s780_s1 + $0x50] sm:$0xff]  ;;  %v291_v54 = vshrl.u32 %v290_v51, 7  ;;  %s627_s8 = smov [#allocation2]  }
   0x7   :  { %537 = vmatpush3.msra.mxu0 %v35_v7  ;;  %545 = vmatprep.subr.mxu1 %v624_v1  ;;  %v494_v28 = vld [vmem:[%s780_s1 + $0xa0] ss:$0 sm:$0xff]  ;;  %v205_v36 = vld [vmem:[%s780_s1 + $0x48] sm:$0xff]  ;;  %v496_v38 = vld [vmem:[%s780_s1 + $0xa1] ss:$0 sm:$0xff]  ;;  %s483_s9 = sshll.u32 %s627_s8, 4  ;;  %s484_s9 = int_to_ptr.vmem [resolvable:$true] %s483_s9 }
   0x8   :  { %538 = vmatprep.subr.mxu0 %v624_v1  ;;  %v18_v13 = vrot.slane %v17_v11, 2  ;;  %v27_v14 = vrot.slane %v26_v12, 2  ;;  %546 = vmatpush3.msra.mxu1 %v121_v25  ;;  %v204_v37 = vld [vmem:[%s780_s1 + $0x40] sm:$0xff]  ;;  %v315_v45 = vld [vmem:[%s780_s1 + $0x98] sm:$0xff]  ;;  %v314_v46 = vld [vmem:[%s780_s1 + $0x90] sm:$0xff]  ;;  %v292_v60 = vsub.s32 0, %v291_v54  ;;  %p607_p1 = scmp.lt.s32.totalorder %s484_s9, %s484_s9 }
   0x9   :  { %539 = vmatpush3.msra.mxu0 %v34_v10  ;;  %547 = vmatprep.subr.mxu1 %v624_v1  ;;  %v313_v47 = vld [vmem:[%s780_s1 + $0x88] sm:$0xff]  ;;  %v312_v48 = vld [vmem:[%s780_s1 + $0x80] sm:$0xff]  ;;  %v311_v49 = vld [vmem:[%s780_s1 + $0x78] sm:$0xff]  ;;  %v296_v61 = vsub.s32 1, %v291_v54  ;;  %s602_s10 = scalar_lea.vmem %s484_s9, 256 }
   0xa   :  { %v19_v15 = vadd.f32 %v18_v13, %v17_v11  ;;  %v28_v16 = vadd.f32 %v27_v14, %v26_v12  ;;  %554 = vmatprep.subr.mxu0 %v624_v1  ;;  %548 = vmatpush3.msra.mxu1 %v120_v26  ;;  %v310_v50 = vld [vmem:[%s780_s1 + $0x70] sm:$0xff]  ;;  %v498_v52 = vld [vmem:[%s780_s1 + $0xa2] ss:$0 sm:$0xff]  ;;  %v309_v53 = vld [vmem:[%s780_s1 + $0x68] sm:$0xff]  ;;  %p603_p0 = scmp.ne.s32.totalorder %s484_s9, %s602_s10  ;;  %p608_p2 = scmp.lt.s32.totalorder %s602_s10, %s602_s10 }
   0xb   :  { %549 = vmatprep.subr.mxu1 %v624_v1  ;;  %v308_v55 = vld [vmem:[%s780_s1 + $0x60] sm:$0xff] }
   0xc   :  { %v20_v17 = vrot.slane %v19_v15, 1  ;;  %v29_v18 = vrot.slane %v28_v16, 1  ;;  %550 = vmatpush3.msra.mxu1 %v119_v27  ;;  %v500_v12 = vld [vmem:[%s780_s1 + $0xa3] ss:$0 sm:$0xff]  ;;  %v506_v54 = vld [vmem:[%s780_s1 + $0xa5] ss:$0 sm:$0xff]  ;;  %p609_p3 = por %p608_p2, %p607_p1 }
   0xd   :  { %565 = vmatprep.subr.mxu1 %v315_v45 }
   0xe   :  { %v21_v19 = vadd.f32 %v20_v17, %v19_v15  ;;  %v30_v20 = vadd.f32 %v29_v18, %v28_v16  ;;  %p610_p4 = pnand %p609_p3, %p603_p0 }
  0x10   :  { %v23_v21 = vmul.f32 0.125, %v21_v19  ;;  %v31_v22 = vmul.f32 0.125, %v30_v20 }
  0x12   :  { %v681_v23 = vsel %vm32_vm2, %v23_v21, %v31_v22 }
  0x13   :  { %541 = vmatmul.mubr.msk.f32.vlgmr.msra.gmra.mxu0 %vm14_vm0, %v681_v23 }
  0x14   :  { %562 = vmatprep.mubr.msk.f32.mxu0 %vm625_vm1, %v624_v1  ;;  %555 = vmatpush3.msra.mxu0 %v207_v34 }
  0x15   :  { %556 = vmatprep.subr.mxu0 %v624_v1 }
  0x16   :  { %557 = vmatpush3.msra.mxu0 %v206_v35 }
  0x17   :  { %558 = vmatprep.subr.mxu0 %v624_v1 }
  0x18   :  { %559 = vmatpush3.msra.mxu0 %v205_v36 }
  0x19   :  { %560 = vmatprep.subr.mxu0 %v624_v1 }
  0x1a   :  { %561 = vmatpush3.msra.mxu0 %v204_v37 }
  0xd3   :  { %v113_v29 = vpop.f32.mrf.mxu0 }
  0xd4   :  { %v114_v30 = vadd.f32 %v494_v28, %v113_v29 }
  0xd5   :  { %v542_v31 = vpop.f32.mrf.mxu0 }
  0xd6   :  { %v117_v32 = vmax.f32 %v114_v30, 0.0 }
  0xd8   :  { %v124_v33 = vadd.f32 %v117_v32, %v681_v23 }
  0xda   :  { %552 = vmatmul.mubr.msk.f32.vlgmr.msra.gmra.mxu1 %vm14_vm0, %v124_v33 }
  0xdb   :  { %566 = vmatpush3.msra.mxu1 %v315_v45 }
  0xdc   :  { %567 = vmatprep.subr.mxu1 %v314_v46 }
  0xdd   :  { %568 = vmatpush3.msra.mxu1 %v314_v46 }
  0xde   :  { %569 = vmatprep.subr.mxu1 %v313_v47 }
  0xdf   :  { %570 = vmatpush3.msra.mxu1 %v313_v47 }
  0xe0   :  { %571 = vmatprep.subr.mxu1 %v312_v48 }
  0xe1   :  { %572 = vmatpush3.msra.mxu1 %v312_v48 }
  0xe2   :  { %573 = vmatprep.subr.mxu1 %v311_v49 }
  0xe3   :  { %574 = vmatpush3.msra.mxu1 %v311_v49 }
  0xe4   :  { %575 = vmatprep.subr.mxu1 %v310_v50 }
  0xe5   :  { %576 = vmatpush3.msra.mxu1 %v310_v50 }
  0xe6   :  { %577 = vmatprep.subr.mxu1 %v309_v53 }
  0xe7   :  { %578 = vmatpush3.msra.mxu1 %v309_v53 }
  0xe8   :  { %579 = vmatprep.subr.mxu1 %v308_v55 }
  0xe9   :  { %580 = vmatpush3.msra.mxu1 %v308_v55 }
 0x19a   :  { %v198_v39 = vpop.f32.mrf.mxu1 }
 0x19b   :  { %v199_v40 = vadd.f32 %v496_v38, %v198_v39 }
 0x19c   :  { %v553_v41 = vpop.f32.mrf.mxu1 }
 0x19d   :  { %v202_v42 = vmax.f32 %v199_v40, 0.0 }
 0x19f   :  { %v203_v43 = vadd.f32 %v202_v42, %v117_v32 }
 0x1a1   :  { %v209_v44 = vadd.f32 %v203_v43, %v681_v23 }
 0x1a3   :  { %563 = vmatmul.mubr.msk.f32.vlgmr.msra.gmra.mxu0 %vm14_vm0, %v209_v44 }
 0x263   :  { %v283_v56 = vpop.f32.mrf.mxu0 }
 0x264   :  { %v284_v57 = vadd.f32 %v498_v52, %v283_v56  ;;  %v505_v52 = vld [vmem:[%s780_s1 + $0xa4] ss:$0 sm:$0xff] }
 0x265   :  { %v564_v58 = vpop.f32.mrf.mxu0 }
 0x266   :  { %v287_v59 = vmax.f32 %v284_v57, 0.0 }
 0x268   :  { %v288_v62 = vadd.f32 %v287_v59, %v203_v43 }
 0x26a   :  { %v289_v63 = vadd.f32 %v288_v62, %v681_v23  ;;  %v293_v0 = vrot.slane %v288_v62, %v292_v60  ;;  %v297_v1 = vrot.slane %v288_v62, %v296_v61 }
 0x26c   :  { %v301_v2 = vrot.slane %v289_v63, %v292_v60  ;;  %v305_v5 = vrot.slane %v289_v63, %v296_v61  ;;  %v306_v6 = vadd.f32 %v293_v0, %v657_v3  ;;  %v307_v9 = vadd.f32 %v297_v1, %v662_v4 }
 0x26e   :  { %319 = vrot.lane.b32.xlu0 %v301_v2, %s626_s29 }
 0x272   :  { %321 = vrot.lane.b32.xlu0 %v305_v5, %s626_s29 }
 0x2e0   :  { %v320_v7 = vpop.permute.xlu0 %319 }
 0x2e1   :  { %v325_v8 = vsel %vm14_vm0, %v306_v6, %v320_v7 }
 0x2e2   :  { %581 = vmatprep.mubr.msk.f32.mxu1 %vm331_vm3, %v325_v8 }
 0x2e4   :  { %v322_v10 = vpop.permute.xlu0 %321 }
 0x2e5   :  { %v326_v11 = vsel %vm14_vm0, %v307_v9, %v322_v10 }
 0x2e6   :  { %582 = vmatmul.mubr.msk.f32.vlgmr.msra.gmra.mxu1 %vm331_vm3, %v326_v11 }
 0x3a6   :  { %v583_v13 = vpop.f32.mrf.mxu1 }
 0x3a7   :  { %v410_v14 = vadd.f32 %v583_v13, %v500_v12 }
 0x3a8   :  { %v404_v15 = vpop.f32.mrf.mxu1 }
 0x3a9   :  { %v504_v16 = vmul.f32 -1.442695, %v410_v14  ;;  %v405_v17 = vadd.f32 %v500_v12, %v404_v15 }
 0x3ab   :  { %590 = vpow2.f32 %v504_v16  ;;  %v503_v18 = vmul.f32 -1.442695, %v405_v17 }
 0x3ad   :  { %592 = vpow2.f32 %v503_v18 }
 0x3b8   :  { %v591_v19 = vpop.eup %590 }
 0x3b9   :  { %v420_v20 = vadd.f32 1.0, %v591_v19 }
 0x3ba   :  { %v593_v21 = vpop.eup %592 }
 0x3bb   :  { %594 = vrcp.f32 %v420_v20  ;;  %v419_v22 = vadd.f32 1.0, %v593_v21 }
 0x3bd   :  { %596 = vrcp.f32 %v419_v22 }
 0x3c8   :  { %v595_v23 = vpop.eup %594 }
 0x3c9   :  { %v428_v24 = vsub.f32 1.0, %v595_v23  ;;  %v426_v30 = vmul.f32 %v595_v23, %v307_v9 }
 0x3ca   :  { %v597_v25 = vpop.eup %596 }
 0x3cb   :  { %v427_v26 = vsub.f32 1.0, %v597_v25  ;;  %v430_v27 = vmul.f32 %v428_v24, %v305_v5  ;;  %v425_v28 = vmul.f32 %v597_v25, %v306_v6 }
 0x3cd   :  { %v429_v29 = vmul.f32 %v427_v26, %v301_v2  ;;  %v432_v32 = vadd.f32 %v430_v27, %v426_v30 }
 0x3cf   :  { %v431_v31 = vadd.f32 %v429_v29, %v425_v28  ;;  %v434_v35 = vadd.f32 %v432_v32, %v662_v4 }
 0x3d1   :  { %v433_v33 = vadd.f32 %v431_v31, %v657_v3  ;;  %v438_v36 = vsel %vm14_vm0, %v434_v35, 0.0 }
 0x3d3   :  { %v435_v34 = vsel %vm14_vm0, %v433_v33, 0.0 }
 0x3d4   :  { %436 = vadd.xlane.f32.xlu1 %v435_v34 }
 0x3d8   :  { %439 = vadd.xlane.f32.xlu1 %v438_v36 }
 0x45d   :  { %v437_v37 = vpop.xlane.xlu1 %436 }
 0x45e   :  { %v442_v38 = vmul.f32 0.03125, %v437_v37 }
 0x460   :  { %v444_v39 = vsub.f32 %v433_v33, %v442_v38 }
 0x461   :  { %v440_v40 = vpop.xlane.xlu1 %439 }
 0x462   :  { %v443_v41 = vmul.f32 0.03125, %v440_v40  ;;  %v446_v42 = vmul.f32 %v444_v39, %v444_v39 }
 0x464   :  { %v445_v43 = vsub.f32 %v434_v35, %v443_v41  ;;  %v448_v44 = vsel %vm14_vm0, %v446_v42, 0.0 }
 0x465   :  { %449 = vadd.xlane.f32.xlu0 %v448_v44 }
 0x466   :  { %v447_v45 = vmul.f32 %v445_v43, %v445_v43 }
 0x468   :  { %v451_v3 = vsel %vm14_vm0, %v447_v45, 0.0 }
 0x469   :  { %452 = vadd.xlane.f32.xlu1 %v451_v3 }
 0x4ee   :  { %v450_v46 = vpop.xlane.xlu0 %449 }
 0x4ef   :  { %v454_v4 = vmul.f32 0.03125, %v450_v46 }
 0x4f1   :  { %v456_v47 = vadd.f32 1e-05, %v454_v4 }
 0x4f2   :  { %v453_v48 = vpop.xlane.xlu1 %452 }
 0x4f3   :  { %598 = vrsqrt.f32 %v456_v47  ;;  %v455_v49 = vmul.f32 0.03125, %v453_v48 }
 0x4f5   :  { %v457_v50 = vadd.f32 1e-05, %v455_v49 }
 0x4f7   :  { %600 = vrsqrt.f32 %v457_v50 }
 0x500   :  { %v599_v51 = vpop.eup %598 }
 0x501   :  { %v460_v53 = vmul.f32 %v599_v51, %v444_v39 }
 0x503   :  { %v467_v55 = vmul.f32 %v505_v52, %v460_v53 }
 0x504   :  { %v601_v56 = vpop.eup %600 }
 0x505   :  { %v461_v57 = vmul.f32 %v601_v56, %v445_v43  ;;  %v474_v58 = vadd.f32 %v506_v54, %v467_v55 }
 0x507   :  { %v468_v59 = vmul.f32 %v505_v52, %v461_v57  ;;  %476 = vst.msk [vmem:[#allocation2] sm:$0xff] %vm14_vm0, %v474_v58 }
 0x509   :  { %v475_v60 = vadd.f32 %v506_v54, %v468_v59 }
 0x50b   :  { %477 = vst.msk [vmem:[#allocation2 + $0x8] sm:$0xff] %vm14_vm0, %v475_v60 }
 0x50c   :  { %613 = shalt.err (!%p610_p4)
}
 0x50d   :  { %s628_s1 = smov 128   ;;  %s629_s11 = smov 8  }
 0x50e   :  { %489 = dma.vmem_to_hbm [thread:$0]  %s484_s9, 256, %s781_s2, [#allocation3], %s628_s1, %s628_s1, %s629_s11  }
 0x50f   :  { %622 = dma.done.wait [#allocation3], 256  }
 0x510   :  { %623 = vsyncadd [#allocation3], 4294967040 }
 0x511   :  { %493 = vsyncpa [#allocation3], 1 }

</bundles_post_ra>
